<compile_context>
chip_gen: v6e
topology: v6e:2x2x1
jax: 0.10.0
libtpu: 0.0.40
codegen_flags: <defaults>
</compile_context>

<pallas_src>
import jax
import jax.numpy as jnp
from jax.experimental import pallas as pl
from jax.experimental.pallas import tpu as pltpu


def _recip(x):
    """EUP approximate reciprocal + one Newton step (~f32 accuracy, no VALU divide)."""
    r = pl.reciprocal(x, approx=True)
    return r * (2.0 - x * r)


def _sigmoid(z):
    # exp and reciprocal both run on the EUP slot; VALU stays free for the gating math.
    return _recip(1.0 + jnp.exp(-z))


def _fusion2to1_kernel(raw_ref, grp_ref, wr_ref, wg_ref, br_ref, bg_ref, o_ref):
    """One lane-packed M-tile per grid step: gated 1x1-conv fusion fully in VMEM.

    raw_ref/grp_ref : (TM, W)   W = pack*C lane-packed channels-last rows
    wr_ref/wg_ref   : (W, 2W)   [gate | input] fused block-diagonal weights
    br_ref/bg_ref   : (1, 2W)   [gate | input] fused lane-tiled biases
    o_ref           : (TM, W)
    """
    r = raw_ref[...]
    g = grp_ref[...]
    w = o_ref.shape[-1]

    zg = jnp.dot(g, wg_ref[...], preferred_element_type=jnp.float32) + bg_ref[...]
    zr = jnp.dot(r, wr_ref[...], preferred_element_type=jnp.float32) + br_ref[...]

    gate_p = _sigmoid(zg[:, :w])      # lane offset 0   (tile aligned)
    gate_i = _sigmoid(zr[:, :w])
    in_p = zg[:, w:]                  # lane offset W   (tile aligned when W % 128 == 0)
    in_i = zr[:, w:]

    fused = gate_p * in_p + gate_i * in_i
    o_ref[...] = (fused * _recip(gate_p + gate_i)).astype(o_ref.dtype)


def fusion2to1_forward(raw, group, params, *, block_m=2048):
    """Replicates fusion2to1.forward.

    raw    : [B, D1, D2, appear_len]   (channels-last module input)
    group  : [B, D1, D2, point_len]
    params : PyTorch-layout Conv2d weights/biases:
        gate_p_w [Cp,Cp,1,1] gate_p_b [Cp];  gate_i_w [Ca,Ca,1,1] gate_i_b [Ca]
        input_p_w [Co,Cp,1,1] input_p_b [Co]; input_i_w [Co,Ca,1,1] input_i_b [Co]
    returns: [B, D1, D2, Co]
    """
    B, D1, D2, Ca = raw.shape
    Cp = group.shape[-1]
    Co = params["input_p_w"].shape[0]
    # The module's gate*input and fused/(gate_p+gate_i) only line up when the channel
    # counts match (the usual configuration).
    # TODO(synk): degenerate broadcast cases (point_len==1 etc.) not implemented.
    assert Ca == Cp == Co, "fusion2to1 kernel assumes appear_len == point_len == out_channels"
    C = Ca
    dtype = jnp.float32

    M = B * D1 * D2

    # Lane-packing factor: pack spatial rows so each row is 128 lanes wide.
    pack = 1
    if C <= 128 and 128 % C == 0:
        pack = 128 // C
        while pack > 1 and M % pack != 0:
            pack //= 2
    W = pack * C
    Mp = M // pack

    # Free row-major reshapes; no transposes / pads of the big tensors.
    raw2d = raw.reshape(Mp, W).astype(dtype)
    grp2d = group.reshape(Mp, W).astype(dtype)

    def w2d(w):                                       # [Cout,Cin,1,1] -> [Cin,Cout]
        return jnp.transpose(w[:, :, 0, 0], (1, 0)).astype(dtype)

    def bdiag(w):                                     # pack copies on the diagonal
        return w if pack == 1 else jax.scipy.linalg.block_diag(*([w] * pack))

    def brow(b):                                      # [Cout] -> [1, pack*Cout]
        return jnp.tile(b.reshape(1, -1).astype(dtype), (1, pack))

    # Fuse (gate | input) weights per input stream: 2 matmuls instead of 4.
    w_g = jnp.concatenate([bdiag(w2d(params["gate_p_w"])),
                           bdiag(w2d(params["input_p_w"]))], axis=1)   # (W, 2W)
    w_r = jnp.concatenate([bdiag(w2d(params["gate_i_w"])),
                           bdiag(w2d(params["input_i_w"]))], axis=1)   # (W, 2W)
    b_g = jnp.concatenate([brow(params["gate_p_b"]),
                           brow(params["input_p_b"])], axis=1)         # (1, 2W)
    b_r = jnp.concatenate([brow(params["gate_i_b"]),
                           brow(params["input_i_b"])], axis=1)         # (1, 2W)

    # Tile M: big tiles for the mem-bound roofline, but keep >= 2 grid steps so both
    # v7x TensorCores get work; sublane-aligned; ragged last block handled by Pallas.
    if Mp <= 8:
        TM = Mp
    else:
        TM = min(block_m, max(8, (pl.cdiv(Mp, 2) // 8) * 8))
    grid_m = pl.cdiv(Mp, TM)

    out2d = pl.pallas_call(
        _fusion2to1_kernel,
        out_shape=jax.ShapeDtypeStruct((Mp, W), dtype),
        grid=(grid_m,),
        in_specs=[
            pl.BlockSpec((TM, W), lambda i: (i, 0)),        # packed raw rows
            pl.BlockSpec((TM, W), lambda i: (i, 0)),        # packed group rows
            pl.BlockSpec((W, 2 * W), lambda i: (0, 0)),     # fused raw-stream weights
            pl.BlockSpec((W, 2 * W), lambda i: (0, 0)),     # fused group-stream weights
            pl.BlockSpec((1, 2 * W), lambda i: (0, 0)),     # fused raw-stream biases
            pl.BlockSpec((1, 2 * W), lambda i: (0, 0)),     # fused group-stream biases
        ],
        out_specs=pl.BlockSpec((TM, W), lambda i: (i, 0)),
        compiler_params=pltpu.CompilerParams(
            dimension_semantics=("parallel",),
            vmem_limit_bytes=32 << 20),
    )(raw2d, grp2d, w_r, w_g, b_r, b_g)

    return out2d.reshape(B, D1, D2, Co)


if __name__ == "__main__":
    B, D1, D2 = 2, 16, 16
    appear_len = point_len = out_channels = 32

    key = jax.random.PRNGKey(0)
    keys = jax.random.split(key, 10)

    raw = jax.random.normal(keys[0], (B, D1, D2, appear_len), jnp.float32)
    group = jax.random.normal(keys[1], (B, D1, D2, point_len), jnp.float32)

    # PyTorch-like Conv2d init: uniform(-1/sqrt(fan_in), 1/sqrt(fan_in)), fan_in = Cin.
    def init_conv(kw, kb, cin, cout):
        bound = 1.0 / (cin ** 0.5)
        w = jax.random.uniform(kw, (cout, cin, 1, 1), jnp.float32, -bound, bound)
        b = jax.random.uniform(kb, (cout,), jnp.float32, -bound, bound)
        return w, b

    gate_p_w, gate_p_b = init_conv(keys[2], keys[3], point_len, point_len)
    gate_i_w, gate_i_b = init_conv(keys[4], keys[5], appear_len, appear_len)
    input_p_w, input_p_b = init_conv(keys[6], keys[7], point_len, out_channels)
    input_i_w, input_i_b = init_conv(keys[8], keys[9], appear_len, out_channels)

    params = dict(
        gate_p_w=gate_p_w, gate_p_b=gate_p_b,
        gate_i_w=gate_i_w, gate_i_b=gate_i_b,
        input_p_w=input_p_w, input_p_b=input_p_b,
        input_i_w=input_i_w, input_i_b=input_i_b)

    out = fusion2to1_forward(raw, group, params)
    out = jax.block_until_ready(out)

    # Reference: emulate the PyTorch module exactly (NCHW permutes + 1x1 convs).
    def conv1x1_nchw(x, w, b):
        return jnp.einsum('bchw,oc->bohw', x, w[:, :, 0, 0]) + b[None, :, None, None]

    r_nchw = jnp.transpose(raw, (0, 3, 2, 1))
    g_nchw = jnp.transpose(group, (0, 3, 2, 1))
    gp = jax.nn.sigmoid(conv1x1_nchw(g_nchw, gate_p_w, gate_p_b))
    gi = jax.nn.sigmoid(conv1x1_nchw(r_nchw, gate_i_w, gate_i_b))
    fused = gp * conv1x1_nchw(g_nchw, input_p_w, input_p_b) \
          + gi * conv1x1_nchw(r_nchw, input_i_w, input_i_b)
    ref = jnp.transpose(fused / (gp + gi), (0, 3, 2, 1))

    assert out.shape == (B, D1, D2, out_channels), out.shape
    err = float(jnp.max(jnp.abs(out - ref)))
    assert err < 1e-4, f"max abs err {err}"
    print("KERNEL_OK")
</pallas_src>

<mosaic_0001>
module attributes {stable_mosaic.version = 11 : i64} {
  func.func @_fusion2to1_kernel(%arg0: i32, %arg1: memref<64x128xf32, #tpu.memory_space<vmem>>, %arg2: memref<64x128xf32, #tpu.memory_space<vmem>>, %arg3: memref<128x256xf32, #tpu.memory_space<vmem>>, %arg4: memref<128x256xf32, #tpu.memory_space<vmem>>, %arg5: memref<1x256xf32, #tpu.memory_space<vmem>>, %arg6: memref<1x256xf32, #tpu.memory_space<vmem>>, %arg7: memref<64x128xf32, #tpu.memory_space<vmem>>) attributes {dimension_semantics = [#tpu.dimension_semantics<parallel>], iteration_bounds = array<i64: 2>, scalar_prefetch = 0 : i64, scratch_operands = 0 : i64, tpu.core_type = #tpu.core_type<tc>, window_params = [{transform_indices = @transform_0, window_bounds = array<i64: 64, 128>}, {transform_indices = @transform_1, window_bounds = array<i64: 64, 128>}, {pipeline_mode = #tpu.pipeline_mode<synchronous>, transform_indices = @transform_2, window_bounds = array<i64: 128, 256>}, {pipeline_mode = #tpu.pipeline_mode<synchronous>, transform_indices = @transform_3, window_bounds = array<i64: 128, 256>}, {pipeline_mode = #tpu.pipeline_mode<synchronous>, transform_indices = @transform_4, window_bounds = array<i64: 1, 256>}, {pipeline_mode = #tpu.pipeline_mode<synchronous>, transform_indices = @transform_5, window_bounds = array<i64: 1, 256>}, {transform_indices = @transform_6, window_bounds = array<i64: 64, 128>}]} {
    %c0 = arith.constant 0 : index
    %c0_0 = arith.constant 0 : index
    %0 = vector.load %arg1[%c0, %c0_0] : memref<64x128xf32, #tpu.memory_space<vmem>>, vector<64x128xf32>
    %c0_1 = arith.constant 0 : index
    %c0_2 = arith.constant 0 : index
    %1 = vector.load %arg2[%c0_1, %c0_2] : memref<64x128xf32, #tpu.memory_space<vmem>>, vector<64x128xf32>
    %c0_3 = arith.constant 0 : index
    %c0_4 = arith.constant 0 : index
    %2 = vector.load %arg4[%c0_3, %c0_4] : memref<128x256xf32, #tpu.memory_space<vmem>>, vector<128x256xf32>
    %cst = arith.constant dense<0.000000e+00> : vector<64x256xf32>
    %3 = tpu.matmul %1, %2, %cst {dimension_numbers = #tpu.dot_dimension_numbers<[1], [0], [0], [1], [0, 0, 1, 1], [], []>} : vector<64x128xf32>, vector<128x256xf32>, vector<64x256xf32> -> vector<64x256xf32>
    %c0_5 = arith.constant 0 : index
    %c0_6 = arith.constant 0 : index
    %4 = vector.load %arg6[%c0_5, %c0_6] : memref<1x256xf32, #tpu.memory_space<vmem>>, vector<1x256xf32>
    %5 = vector.broadcast %4 : vector<1x256xf32> to vector<64x256xf32>
    %6 = arith.addf %3, %5 : vector<64x256xf32>
    %c0_7 = arith.constant 0 : index
    %c0_8 = arith.constant 0 : index
    %7 = vector.load %arg3[%c0_7, %c0_8] : memref<128x256xf32, #tpu.memory_space<vmem>>, vector<128x256xf32>
    %cst_9 = arith.constant dense<0.000000e+00> : vector<64x256xf32>
    %8 = tpu.matmul %0, %7, %cst_9 {dimension_numbers = #tpu.dot_dimension_numbers<[1], [0], [0], [1], [0, 0, 1, 1], [], []>} : vector<64x128xf32>, vector<128x256xf32>, vector<64x256xf32> -> vector<64x256xf32>
    %c0_10 = arith.constant 0 : index
    %c0_11 = arith.constant 0 : index
    %9 = vector.load %arg5[%c0_10, %c0_11] : memref<1x256xf32, #tpu.memory_space<vmem>>, vector<1x256xf32>
    %10 = vector.broadcast %9 : vector<1x256xf32> to vector<64x256xf32>
    %11 = arith.addf %8, %10 : vector<64x256xf32>
    %12 = vector.extract_strided_slice %6 {offsets = [0, 0], sizes = [64, 128], strides = [1, 1]} : vector<64x256xf32> to vector<64x128xf32>
    %cst_12 = arith.constant 0.000000e+00 : f32
    %13 = vector.broadcast %cst_12 : f32 to vector<64x128xf32>
    %14 = arith.subf %13, %12 : vector<64x128xf32>
    %15 = math.exp %14 : vector<64x128xf32>
    %cst_13 = arith.constant 1.000000e+00 : f32
    %16 = vector.broadcast %cst_13 : f32 to vector<64x128xf32>
    %17 = arith.addf %16, %15 : vector<64x128xf32>
    %18 = tpu.reciprocal %17 {approx = true} : vector<64x128xf32> -> vector<64x128xf32>
    %19 = arith.mulf %17, %18 : vector<64x128xf32>
    %cst_14 = arith.constant 2.000000e+00 : f32
    %20 = vector.broadcast %cst_14 : f32 to vector<64x128xf32>
    %21 = arith.subf %20, %19 : vector<64x128xf32>
    %22 = arith.mulf %18, %21 : vector<64x128xf32>
    %23 = vector.extract_strided_slice %11 {offsets = [0, 0], sizes = [64, 128], strides = [1, 1]} : vector<64x256xf32> to vector<64x128xf32>
    %cst_15 = arith.constant 0.000000e+00 : f32
    %24 = vector.broadcast %cst_15 : f32 to vector<64x128xf32>
    %25 = arith.subf %24, %23 : vector<64x128xf32>
    %26 = math.exp %25 : vector<64x128xf32>
    %cst_16 = arith.constant 1.000000e+00 : f32
    %27 = vector.broadcast %cst_16 : f32 to vector<64x128xf32>
    %28 = arith.addf %27, %26 : vector<64x128xf32>
    %29 = tpu.reciprocal %28 {approx = true} : vector<64x128xf32> -> vector<64x128xf32>
    %30 = arith.mulf %28, %29 : vector<64x128xf32>
    %cst_17 = arith.constant 2.000000e+00 : f32
    %31 = vector.broadcast %cst_17 : f32 to vector<64x128xf32>
    %32 = arith.subf %31, %30 : vector<64x128xf32>
    %33 = arith.mulf %29, %32 : vector<64x128xf32>
    %34 = vector.extract_strided_slice %6 {offsets = [0, 128], sizes = [64, 128], strides = [1, 1]} : vector<64x256xf32> to vector<64x128xf32>
    %35 = vector.extract_strided_slice %11 {offsets = [0, 128], sizes = [64, 128], strides = [1, 1]} : vector<64x256xf32> to vector<64x128xf32>
    %36 = arith.mulf %22, %34 : vector<64x128xf32>
    %37 = arith.mulf %33, %35 : vector<64x128xf32>
    %38 = arith.addf %36, %37 : vector<64x128xf32>
    %39 = arith.addf %22, %33 : vector<64x128xf32>
    %40 = tpu.reciprocal %39 {approx = true} : vector<64x128xf32> -> vector<64x128xf32>
    %41 = arith.mulf %39, %40 : vector<64x128xf32>
    %cst_18 = arith.constant 2.000000e+00 : f32
    %42 = vector.broadcast %cst_18 : f32 to vector<64x128xf32>
    %43 = arith.subf %42, %41 : vector<64x128xf32>
    %44 = arith.mulf %40, %43 : vector<64x128xf32>
    %45 = arith.mulf %38, %44 : vector<64x128xf32>
    %c0_19 = arith.constant 0 : index
    %c0_20 = arith.constant 0 : index
    %46 = vector.load %arg7[%c0_19, %c0_20] : memref<64x128xf32, #tpu.memory_space<vmem>>, vector<64x128xf32>
    tpu.vector_store %arg7[%c0_19, %c0_20], %45 {strides = array<i32>} : memref<64x128xf32, #tpu.memory_space<vmem>>, vector<64x128xf32>,
    return
  }
  func.func @transform_0(%arg0: i32) -> (i32, i32) {
    %c0_i32 = arith.constant 0 : i32
    %c0_i32_0 = arith.constant 0 : i32
    return %arg0, %c0_i32 : i32, i32
  }
  func.func @transform_1(%arg0: i32) -> (i32, i32) {
    %c0_i32 = arith.constant 0 : i32
    %c0_i32_0 = arith.constant 0 : i32
    return %arg0, %c0_i32 : i32, i32
  }
  func.func @transform_2(%arg0: i32) -> (i32, i32) {
    %c0_i32 = arith.constant 0 : i32
    %c0_i32_0 = arith.constant 0 : i32
    %c0_i32_1 = arith.constant 0 : i32
    return %c0_i32, %c0_i32_0 : i32, i32
  }
  func.func @transform_3(%arg0: i32) -> (i32, i32) {
    %c0_i32 = arith.constant 0 : i32
    %c0_i32_0 = arith.constant 0 : i32
    %c0_i32_1 = arith.constant 0 : i32
    return %c0_i32, %c0_i32_0 : i32, i32
  }
  func.func @transform_4(%arg0: i32) -> (i32, i32) {
    %c0_i32 = arith.constant 0 : i32
    %c0_i32_0 = arith.constant 0 : i32
    %c0_i32_1 = arith.constant 0 : i32
    return %c0_i32, %c0_i32_0 : i32, i32
  }
  func.func @transform_5(%arg0: i32) -> (i32, i32) {
    %c0_i32 = arith.constant 0 : i32
    %c0_i32_0 = arith.constant 0 : i32
    %c0_i32_1 = arith.constant 0 : i32
    return %c0_i32, %c0_i32_0 : i32, i32
  }
  func.func @transform_6(%arg0: i32) -> (i32, i32) {
    %c0_i32 = arith.constant 0 : i32
    %c0_i32_0 = arith.constant 0 : i32
    return %arg0, %c0_i32 : i32, i32
  }
}

</mosaic_0001>

<bundles_post_ra>
// kernel: tpu_custom_call.1
= control target key start
LH: loop header
LB: loop body
LE: loop exit
PB: predicated region body
PF: predicated region fallthrough
CT: control target
= control target key end

     0   :  { %s1885_s0 = inlined_call_operand.hbm [shape: f32[128,128], index: 0, kind: input, shape index: {}]   ;;  %s1886_s1 = inlined_call_operand.hbm [shape: f32[128,128], index: 1, kind: input, shape index: {}]   ;;  %s1887_s2 = inlined_call_operand.hbm [shape: f32[128,256], index: 2, kind: input, shape index: {}]   ;;  %s1888_s3 = inlined_call_operand.hbm [shape: f32[128,256], index: 3, kind: input, shape index: {}]   ;;  %s1889_s4 = inlined_call_operand.vmem [shape: f32[1,256], index: 4, kind: input, shape index: {}]   ;;  %s1890_s5 = inlined_call_operand.vmem [shape: f32[1,256], index: 5, kind: input, shape index: {}]   ;;  %s1891_s6 = inlined_call_operand.hbm [shape: f32[128,128], index: 6, kind: output, shape index: {}]  }
   0x1   :  { %1896 = sst [smem:[#allocation16_spill]] %s1885_s0 }
   0x2   :  { %1897 = sst [smem:[#allocation17_spill]] %s1887_s2 }
   0x3   :  { %1898 = sst [smem:[#allocation18_spill]] %s1888_s3 }
   0x4   :  { %11 = vsyncpa [#allocation3], 0 }
   0x5   :  { %13 = vsyncpa [#allocation3 + $0x1], 0 }
   0x6   :  { %14 = vsyncpa [#allocation6], 0 }
   0x7   :  { %16 = vsyncpa [#allocation6 + $0x1], 0 }
   0x8   :  { %17 = vsyncpa [#allocation9], 0 }
   0x9   :  { %18 = vsyncpa [#allocation4], 0 }
   0xa   :  { %20 = vsyncpa [#allocation4 + $0x1], 0  ;;  %s1426_s21 = smov 0   ;;  %s1428_s22 = smov 0  }
   0xb   :  { %s1430_s23 = smov 0   ;;  %s1432_s24 = smov 0  }
   0xc LB: > { %s1447_s25 = sadd.s32 4294967295, %s1377_s24   ;;  %s1009_s26 = sadd.s32 4294967294, %s1377_s24   ;;  %s1377_s24 = sphi %s1432_s24, %s1921_s24   ;;  %s1373_s23 = sphi %s1430_s23, %s1920_s23   ;;  %s1369_s22 = sphi %s1428_s22, %s1919_s22   ;;  %s1365_s21 = sphi %s1426_s21, %s1918_s21  }
   0xd   : > { %p46_p0 = scmp.ne.s32.totalorder %s1369_s22, %s1365_s21  ;;  %p1892_p1 = scmp.eq.s32.totalorder %s1447_s25, 0 }
   0xe   : > { %p186_p3 = scmp.eq.s32.totalorder %s1009_s26, 1  ;;  %p1010_p5 = scmp.ge.s32.totalorder %s1377_s24, 1 }
   0xf   : > { %p1456_p4 = por %p1892_p1, %p46_p0  ;;  %p193_p7 = scmp.lt.s32.totalorder %s1377_s24, 3 }
  0x10   : > { %p1461_p6 = por %p186_p3, %p46_p0  ;;  %s1379_s30 = smov [#allocation7]  }
  0x11   : > { %s1899_s27 = scalar_select %p1456_p4, 1, 0 }
  0x12   : > { %s1900_s28 = scalar_select %p1461_p6, 1, 0 }
  0x13   : > { %p1466_p8 = pnand %p1010_p5, %p193_p7  ;;  %s205_s7 = sshll.u32 %s1379_s30, 4  ;;  %s206_s7 = int_to_ptr.vmem [resolvable:$true] %s205_s7 }
  0x14   : > { %s1380_s9 = smov [#allocation8]   ;;  %s1204_s11 = scalar_lea.vmem %s206_s7, 4096 }
  0x15   : > { %p1048_p9 = pneg %p1466_p8  ;;  %s218_s10 = sshll.u32 %s1380_s9, 4  ;;  %s219_s10 = int_to_ptr.vmem [resolvable:$true] %s218_s10 }
  0x16   : > { %p1205_p13 = scmp.ne.s32.totalorder %s206_s7, %s1204_s11  ;;  %p1212_p5 = scmp.lt.s32.totalorder %s206_s7, %s206_s7 }
  0x17   : > { %p1475_p11 = pnand %p1048_p9, %p1892_p1  ;;  %p1213_p7 = scmp.lt.s32.totalorder %s1204_s11, %s1204_s11 }
  0x19   : > { %p1195_p12 = pneg %p1475_p11  ;;  %p1214_p10 = por %p1213_p7, %p1212_p5 }
  0x1b   : > { %p1207_p0 = pnand %p1205_p13, %p1195_p12 }
  0x1d   : > { %p1208_p3 = pneg %p1207_p0 }
  0x1f   : > { %p1215_p9 = pnand %p1214_p10, %p1208_p3 }
  0x21   : > { %1218 = shalt.err (!%p1215_p9)
}
  0x22   : > { %s1381_s12 = smov 256   ;;  %s1382_s13 = smov 16  }
  0x23   : > { %s1903_s2 = sld [smem:[#allocation17_spill]]  ;;  %s1230_s16 = scalar_lea.vmem %s219_s10, 4096 }
  0x24   : > { %p1231_p1 = scmp.ne.s32.totalorder %s219_s10, %s1230_s16  ;;  %p1238_p2 = scmp.lt.s32.totalorder %s219_s10, %s219_s10 }
  0x25   : > { %p1239_p6 = scmp.lt.s32.totalorder %s1230_s16, %s1230_s16 }
  0x26   : > { %p1233_p13 = pnand %p1231_p1, %p1195_p12 }
  0x27   : > { %p1240_p5 = por %p1239_p6, %p1238_p2 }
  0x28   : > { %p1234_p0 = pneg %p1233_p13 }
  0x29   : > { %1051 = dma.hbm_to_vmem [thread:$0]  (!%p1475_p11), %s1903_s2, 4096, %s206_s7, [#allocation6], %s1381_s12, %s1381_s12, %s1382_s13  }
  0x2a   : > { %p1241_p10 = pnand %p1240_p5, %p1234_p0 }
  0x2c   : > { %1244 = shalt.err (!%p1241_p10)
}
  0x2d   : > { %s1904_s3 = sld [smem:[#allocation18_spill]]  ;;  %s1498_s19 = sadd.s32 1, %s1377_s24  }
  0x2e   : > { %s33_s20 = sadd.s32 1, %s1373_s23  ;;  %s30_s26 = ssub.s32 %s1377_s24, %s1498_s19 }
  0x2f   : > { %p40_p1 = scmp.ne.s32.totalorder %s1373_s23, %s1369_s22  ;;  %p31_p2 = scmp.eq.s32.totalorder %s30_s26, 0 }
  0x30   : > { %p41_p6 = scmp.eq.s32.totalorder %s1377_s24, 0  ;;  %p1905_p12 = scmp.eq.s32.totalorder %s1447_s25, 1 }
  0x31   : > { %p1068_p7 = scmp.lt.s32.totalorder %s1377_s24, 2  ;;  %s238_s8 = sand.u32 1, %s1373_s23  }
  0x32   : > { %p1508_p3 = por %p1905_p12, %p40_p1  ;;  %p42_p9 = por %p41_p6, %p40_p1 }
  0x33   : > { %1054 = dma.hbm_to_vmem [thread:$0]  (!%p1475_p11), %s1904_s3, 4096, %s219_s10, [#allocation9], %s1381_s12, %s1381_s12, %s1382_s13  }
  0x34   : > { %s1906_s30 = scalar_select %p1508_p3, 1, 0 }
  0x35   : > { %s1514_s7 = scalar_select %p31_p2, %s1373_s23, %s33_s20  }
  0x36   : > { %s1517_s9 = sshll.u32 %s238_s8, 6  ;;  %s1893_s10 = sshll.u32 %s1377_s24, 10 }
  0x37   : > { %s1907_s0 = sld [smem:[#allocation16_spill]]  ;;  %s242_s14 = scalar_lea.vmem [#allocation2], %s1517_s9 }
  0x38   : > { %s249_s15 = sshll.u32 %s242_s14, 4  ;;  %p1530_p11 = pnand %p1068_p7, %p42_p9  ;;  %s1528_s15 = int_to_ptr.vmem [resolvable:$true] %s249_s15 }
  0x39   : > { %s1534_s17 = scalar_lea.sflag [#allocation3], %s238_s8 }
  0x3a   : > { %p1247_p0 = pneg %p1530_p11 }
  0x3d   : > { %s1525_s13 = scalar_lea.hbm %s1907_s0, %s1893_s10  ;;  %s1250_s11 = scalar_lea.hbm %s1907_s0, 2048 }
  0x3e   : > { %s1245_s18 = scalar_lea.hbm %s1525_s13, 1024  ;;  %p1251_p1 = scmp.lt.s32.totalorder %s1525_s13, %s1907_s0 }
  0x3f   : > { %p1246_p13 = scmp.ne.s32.totalorder %s1525_s13, %s1245_s18  ;;  %p1252_p2 = scmp.lt.s32.totalorder %s1250_s11, %s1245_s18 }
  0x41   : > { %p1248_p5 = pnand %p1247_p0, %p1246_p13  ;;  %p1253_p6 = por %p1252_p2, %p1251_p1 }
  0x43   : > { %p1249_p10 = pneg %p1248_p5 }
  0x45   : > { %p1254_p12 = pnand %p1253_p6, %p1249_p10 }
  0x47   : > { %1257 = shalt.err (!%p1254_p12)
}
  0x48   : > { %s1258_s8 = scalar_lea.vmem %s1528_s15, 1024  ;;  %s1383_s20 = smov [#allocation2]  }
  0x49   : > { %p1259_p7 = scmp.ne.s32.totalorder %s1528_s15, %s1258_s8  ;;  %s1263_s26 = sshll.u32 %s1383_s20, 4  ;;  %s1264_s26 = int_to_ptr.vmem [resolvable:$false] %s1263_s26 }
  0x4a   : > { %s1265_s10 = scalar_lea.vmem %s1264_s26, 2048  ;;  %p1266_p5 = scmp.lt.s32.totalorder %s1528_s15, %s1264_s26 }
  0x4b   : > { %p1261_p9 = pnand %p1259_p7, %p1247_p0  ;;  %p1267_p3 = scmp.lt.s32.totalorder %s1265_s10, %s1258_s8 }
  0x4d   : > { %p1262_p13 = pneg %p1261_p9  ;;  %p1268_p4 = por %p1267_p3, %p1266_p5 }
  0x4f   : > { %p1269_p1 = pnand %p1268_p4, %p1262_p13 }
  0x51   : > { %1272 = shalt.err (!%p1269_p1)
}
  0x52   : > { %s1384_s18 = smov 128   ;;  %s1385_s11 = smov 8  }
  0x53   : > { %1058 = dma.hbm_to_vmem [thread:$0]  (!%p1530_p11), %s1525_s13, 1024, %s1528_s15, %s1534_s17, %s1384_s18, %s1384_s18, %s1385_s11  }
  0x54   : > { %s1909_s12 = sshll.u32 %s1377_s24, 10  ;;  %s263_s20 = scalar_lea.vmem [#allocation5], %s1517_s9 }
  0x55   : > { %s1569_s8 = scalar_lea.hbm %s1886_s1, %s1909_s12  ;;  %s270_s26 = sshll.u32 %s263_s20, 4  ;;  %s1572_s26 = int_to_ptr.vmem [resolvable:$true] %s270_s26 }
  0x56   : > { %s259_s0 = sand.u32 1, %s1377_s24   ;;  %s1273_s3 = scalar_lea.hbm %s1569_s8, 1024 }
  0x57   : > { %s260_s2 = scalar_lea.sflag [#allocation6], %s259_s0  ;;  %p1274_p4 = scmp.ne.s32.totalorder %s1569_s8, %s1273_s3 }
  0x58   : > { %s1278_s17 = scalar_lea.hbm %s1886_s1, 2048  ;;  %p1279_p2 = scmp.lt.s32.totalorder %s1569_s8, %s1886_s1 }
  0x59   : > { %p1276_p3 = pnand %p1274_p4, %p1247_p0  ;;  %p1280_p6 = scmp.lt.s32.totalorder %s1278_s17, %s1273_s3 }
  0x5b   : > { %p1277_p10 = pneg %p1276_p3  ;;  %p1281_p12 = por %p1280_p6, %p1279_p2 }
  0x5d   : > { %p1282_p7 = pnand %p1281_p12, %p1277_p10 }
  0x5f   : > { %1285 = shalt.err (!%p1282_p7)
}
  0x60   : > { %s1286_s0 = scalar_lea.vmem %s1572_s26, 1024  ;;  %s1386_s9 = smov [#allocation5]  }
  0x61   : > { %p1287_p9 = scmp.ne.s32.totalorder %s1572_s26, %s1286_s0  ;;  %s1291_s14 = sshll.u32 %s1386_s9, 4  ;;  %s1292_s14 = int_to_ptr.vmem [resolvable:$false] %s1291_s14 }
  0x62   : > { %s1293_s20 = scalar_lea.vmem %s1292_s14, 2048  ;;  %p1294_p1 = scmp.lt.s32.totalorder %s1572_s26, %s1292_s14 }
  0x63   : > { %p1289_p13 = pnand %p1287_p9, %p1247_p0  ;;  %p1295_p4 = scmp.lt.s32.totalorder %s1293_s20, %s1286_s0 }
  0x65   : > { %p1290_p5 = pneg %p1289_p13  ;;  %p1296_p3 = por %p1295_p4, %p1294_p1 }
  0x67   : > { %p1297_p2 = pnand %p1296_p3, %p1290_p5 }
  0x69   : > { %1300 = shalt.err (!%p1297_p2)
}
  0x6a   : > { %1061 = dma.hbm_to_vmem [thread:$0]  (!%p1530_p11), %s1569_s8, 1024, %s1572_s26, %s260_s2, %s1384_s18, %s1384_s18, %s1385_s11  }
  0x6b   : > { %282 = sbr.rel (%p1466_p8) target bundleno = 461 (0x1cd), region = 44  ;;  %s1603_s3 = sand.u32 (!%p1466_p8), 1, %s1369_s22  }
  0x6c   : > { %s1606_s13 = sshll.u32 (!%p1466_p8), %s1603_s3, 6  ;;  %s285_s15 = scalar_lea.sflag (!%p1466_p8), [#allocation3], %s1603_s3 }
  0x6d   : > { %s1610_s16 = scalar_lea.vmem (!%p1466_p8), [#allocation2], %s1606_s13  ;;  %p1910_p0 = scmp.ne.s32.totalorder (!%p1466_p8), %s1899_s27, 0 }
  0x70   : > { %1344 = dma.done.wait (%p1910_p0), %s285_s15, 1024  }
  0x71   : > { %1346 = vsyncadd (%p1910_p0), %s285_s15, 4294966272  ;;  %s293_s2 = sand.u32 1, %s1447_s25   ;;  %s1618_s18 = scalar_lea.vmem [#allocation5], %s1606_s13 }
  0x72   : > { %s294_s29 = scalar_lea.sflag [#allocation6], %s293_s2 }
  0x73   : > { %1348 = dma.done.wait (%p1910_p0), %s294_s29, 1024  }
  0x74   : > { %1350 = vsyncadd (%p1910_p0), %s294_s29, 4294966272  ;;  %p1911_p8 = scmp.eq.s32.totalorder %s1447_s25, 0 }
  0x76   : > { %1352 = dma.done.wait (%p1911_p8), [#allocation6], 4096   ;;  %p1912_p11 = pmov %p1911_p8 }
  0x77   : > { %p1913_p10 = pmov %p1911_p8 }
  0x78   : > { %1354 = vsyncadd (%p1912_p11), [#allocation6], 4294963200 }
  0x79   : > { %1356 = dma.done.wait (%p1913_p10), [#allocation9], 4096   ;;  %p1914_p6 = pmov %p1911_p8 }
  0x7a   : > { %v1387_v0 = vmov 0.0   ;;  %v389_v1 = vld [vmem:[#allocation8 + $0xf8] sm:$0xff]  ;;  %v388_v3 = vld [vmem:[#allocation8 + $0xf0] sm:$0xff]  ;;  %v387_v5 = vld [vmem:[#allocation8 + $0xe8] sm:$0xff]  ;;  %s1797_s17 = scalar_lea.vmem [#allocation10], %s1606_s13  ;;  %s1033_s12 = sshll.u32 %s1447_s25, 10 }
  0x7b   : > { %1358 = vsyncadd (%p1914_p6), [#allocation9], 4294963200  ;;  %466 = vmatprep.mubr.f32.mxu0 %v1387_v0  ;;  %623 = vmatprep.mubr.f32.mxu1 %v1387_v0  ;;  %v546_v2 = vld [vmem:[#allocation7 + $0xf8] sm:$0xff]  ;;  %v545_v4 = vld [vmem:[#allocation7 + $0xf0] sm:$0xff]  ;;  %s894_s10 = sshll.u32 %s1797_s17, 4  ;;  %s1839_s14 = scalar_lea.hbm %s1891_s6, %s1033_s12  ;;  %s1841_s10 = int_to_ptr.vmem [resolvable:$true] %s894_s10 }
  0x7c   : > { %402 = vmatprep.subr.mxu0 %v389_v1  ;;  %559 = vmatprep.subr.mxu1 %v546_v2  ;;  %v544_v6 = vld [vmem:[#allocation7 + $0xe8] sm:$0xff]  ;;  %v386_v7 = vld [vmem:[#allocation8 + $0xe0] sm:$0xff]  ;;  %v385_v9 = vld [vmem:[#allocation8 + $0xd8] sm:$0xff]  ;;  %s881_s20 = scalar_lea.sflag [#allocation4], %s1603_s3  ;;  %s1301_s13 = scalar_lea.vmem %s1841_s10, 1024 }
  0x7d   : > { %403 = vmatpush1.msra.mxu0 %v388_v3  ;;  %560 = vmatpush1.msra.mxu1 %v545_v4  ;;  %v543_v8 = vld [vmem:[#allocation7 + $0xe0] sm:$0xff]  ;;  %v542_v10 = vld [vmem:[#allocation7 + $0xd8] sm:$0xff]  ;;  %v384_v11 = vld [vmem:[#allocation8 + $0xd0] sm:$0xff]  ;;  %p1302_p12 = scmp.ne.s32.totalorder %s1841_s10, %s1301_s13  ;;  %p1915_p7 = scmp.ne.s32.totalorder %s1906_s30, 0 }
  0x7e   : > { %404 = vmatprep.subr.mxu0 %v387_v5  ;;  %561 = vmatprep.subr.mxu1 %v544_v6  ;;  %v541_v12 = vld [vmem:[#allocation7 + $0xd0] sm:$0xff]  ;;  %v383_v13 = vld [vmem:[#allocation8 + $0xc8] sm:$0xff]  ;;  %v382_v15 = vld [vmem:[#allocation8 + $0xc0] sm:$0xff]  ;;  %s1388_s25 = smov [#allocation10]  }
  0x7f   : > { %405 = vmatpush1.msra.mxu0 %v386_v7  ;;  %562 = vmatpush1.msra.mxu1 %v543_v8  ;;  %v540_v14 = vld [vmem:[#allocation7 + $0xc8] sm:$0xff]  ;;  %v539_v16 = vld [vmem:[#allocation7 + $0xc0] sm:$0xff]  ;;  %v381_v17 = vld [vmem:[#allocation8 + $0xb8] sm:$0xff]  ;;  %p1303_p9 = pnand %p1302_p12, %p1915_p7  ;;  %s1305_s15 = sshll.u32 %s1388_s25, 4  ;;  %s1306_s15 = int_to_ptr.vmem [resolvable:$false] %s1305_s15 }
  0x80   : > { %406 = vmatprep.subr.mxu0 %v385_v9  ;;  %563 = vmatprep.subr.mxu1 %v542_v10  ;;  %v538_v18 = vld [vmem:[#allocation7 + $0xb8] sm:$0xff]  ;;  %v380_v19 = vld [vmem:[#allocation8 + $0xb0] sm:$0xff]  ;;  %v379_v21 = vld [vmem:[#allocation8 + $0xa8] sm:$0xff]  ;;  %p1308_p5 = scmp.lt.s32.totalorder %s1841_s10, %s1306_s15 }
  0x81   : > { %407 = vmatpush1.msra.mxu0 %v384_v11  ;;  %564 = vmatpush1.msra.mxu1 %v541_v12  ;;  %v537_v20 = vld [vmem:[#allocation7 + $0xb0] sm:$0xff]  ;;  %v536_v22 = vld [vmem:[#allocation7 + $0xa8] sm:$0xff]  ;;  %v378_v23 = vld [vmem:[#allocation8 + $0xa0] sm:$0xff]  ;;  %p1304_p13 = pneg %p1303_p9 }
  0x82   : > { %408 = vmatprep.subr.mxu0 %v383_v13  ;;  %565 = vmatprep.subr.mxu1 %v540_v14  ;;  %v535_v24 = vld [vmem:[#allocation7 + $0xa0] sm:$0xff]  ;;  %v377_v25 = vld [vmem:[#allocation8 + $0x98] sm:$0xff]  ;;  %v376_v27 = vld [vmem:[#allocation8 + $0x90] sm:$0xff] }
  0x83   : > { %409 = vmatpush1.msra.mxu0 %v382_v15  ;;  %566 = vmatpush1.msra.mxu1 %v539_v16  ;;  %v534_v26 = vld [vmem:[#allocation7 + $0x98] sm:$0xff]  ;;  %v533_v28 = vld [vmem:[#allocation7 + $0x90] sm:$0xff]  ;;  %v375_v29 = vld [vmem:[#allocation8 + $0x88] sm:$0xff] }
  0x84   : > { %410 = vmatprep.subr.mxu0 %v381_v17  ;;  %567 = vmatprep.subr.mxu1 %v538_v18  ;;  %v532_v30 = vld [vmem:[#allocation7 + $0x88] sm:$0xff]  ;;  %v374_v31 = vld [vmem:[#allocation8 + $0x80] sm:$0xff]  ;;  %v373_v33 = vld [vmem:[#allocation8 + $0x78] sm:$0xff]  ;;  %v392_v18 = vlaneseq }
  0x85   : > { %411 = vmatpush1.msra.mxu0 %v380_v19  ;;  %568 = vmatpush1.msra.mxu1 %v537_v20  ;;  %v531_v32 = vld [vmem:[#allocation7 + $0x80] sm:$0xff]  ;;  %v530_v34 = vld [vmem:[#allocation7 + $0x78] sm:$0xff]  ;;  %v372_v35 = vld [vmem:[#allocation8 + $0x70] sm:$0xff] }
  0x86   : > { %412 = vmatprep.subr.mxu0 %v379_v21  ;;  %569 = vmatprep.subr.mxu1 %v536_v22  ;;  %v529_v36 = vld [vmem:[#allocation7 + $0x70] sm:$0xff]  ;;  %v371_v37 = vld [vmem:[#allocation8 + $0x68] sm:$0xff]  ;;  %v370_v39 = vld [vmem:[#allocation8 + $0x60] sm:$0xff]  ;;  %v1664_v19 = vshrl.u32 %v392_v18, 7 }
  0x87   : > { %413 = vmatpush1.msra.mxu0 %v378_v23  ;;  %570 = vmatpush1.msra.mxu1 %v535_v24  ;;  %v528_v38 = vld [vmem:[#allocation7 + $0x68] sm:$0xff]  ;;  %v527_v40 = vld [vmem:[#allocation7 + $0x60] sm:$0xff]  ;;  %v369_v41 = vld [vmem:[#allocation8 + $0x58] sm:$0xff] }
  0x88   : > { %414 = vmatprep.subr.mxu0 %v377_v25  ;;  %571 = vmatprep.subr.mxu1 %v534_v26  ;;  %v526_v42 = vld [vmem:[#allocation7 + $0x58] sm:$0xff]  ;;  %v368_v43 = vld [vmem:[#allocation8 + $0x50] sm:$0xff]  ;;  %v367_v45 = vld [vmem:[#allocation8 + $0x48] sm:$0xff]  ;;  %v394_v20 = vsub.s32 0, %v1664_v19 }
  0x89   : > { %415 = vmatpush1.msra.mxu0 %v376_v27  ;;  %572 = vmatpush1.msra.mxu1 %v533_v28  ;;  %v525_v44 = vld [vmem:[#allocation7 + $0x50] sm:$0xff]  ;;  %v524_v46 = vld [vmem:[#allocation7 + $0x48] sm:$0xff]  ;;  %v366_v47 = vld [vmem:[#allocation8 + $0x40] sm:$0xff] }
  0x8a   : > { %416 = vmatprep.subr.mxu0 %v375_v29  ;;  %573 = vmatprep.subr.mxu1 %v532_v30  ;;  %v523_v48 = vld [vmem:[#allocation7 + $0x40] sm:$0xff]  ;;  %v365_v49 = vld [vmem:[#allocation8 + $0x38] sm:$0xff]  ;;  %v364_v51 = vld [vmem:[#allocation8 + $0x30] sm:$0xff] }
  0x8b   : > { %417 = vmatpush1.msra.mxu0 %v374_v31  ;;  %574 = vmatpush1.msra.mxu1 %v531_v32  ;;  %v522_v50 = vld [vmem:[#allocation7 + $0x38] sm:$0xff]  ;;  %v521_v52 = vld [vmem:[#allocation7 + $0x30] sm:$0xff]  ;;  %v363_v53 = vld [vmem:[#allocation8 + $0x28] sm:$0xff] }
  0x8c   : > { %418 = vmatprep.subr.mxu0 %v373_v33  ;;  %575 = vmatprep.subr.mxu1 %v530_v34  ;;  %v520_v54 = vld [vmem:[#allocation7 + $0x28] sm:$0xff]  ;;  %v362_v55 = vld [vmem:[#allocation8 + $0x20] sm:$0xff]  ;;  %v361_v57 = vld [vmem:[#allocation8 + $0x18] sm:$0xff] }
  0x8d   : > { %419 = vmatpush1.msra.mxu0 %v372_v35  ;;  %576 = vmatpush1.msra.mxu1 %v529_v36  ;;  %v519_v56 = vld [vmem:[#allocation7 + $0x20] sm:$0xff]  ;;  %v518_v58 = vld [vmem:[#allocation7 + $0x18] sm:$0xff]  ;;  %v360_v59 = vld [vmem:[#allocation8 + $0x10] sm:$0xff] }
  0x8e   : > { %420 = vmatprep.subr.mxu0 %v371_v37  ;;  %577 = vmatprep.subr.mxu1 %v528_v38  ;;  %v517_v60 = vld [vmem:[#allocation7 + $0x10] sm:$0xff]  ;;  %v359_v61 = vld [vmem:[#allocation8 + $0x8] sm:$0xff]  ;;  %v358_v63 = vld [vmem:[#allocation8] sm:$0xff] }
  0x8f   : > { %421 = vmatpush1.msra.mxu0 %v370_v39  ;;  %578 = vmatpush1.msra.mxu1 %v527_v40  ;;  %v516_v62 = vld [vmem:[#allocation7 + $0x8] sm:$0xff]  ;;  %v515_v1 = vld [vmem:[#allocation7] sm:$0xff]  ;;  %v352_v6 = vld [vmem:[%s1618_s18 + $0x10] sm:$0xff] }
  0x90   : > { %422 = vmatprep.subr.mxu0 %v369_v41  ;;  %579 = vmatprep.subr.mxu1 %v526_v42  ;;  %v350_v2 = vld [vmem:[%s1618_s18] sm:$0xff]  ;;  %v351_v4 = vld [vmem:[%s1618_s18 + $0x8] sm:$0xff]  ;;  %v344_v7 = vld [vmem:[%s1610_s16 + $0x10] sm:$0xff] }
  0x91   : > { %423 = vmatpush1.msra.mxu0 %v368_v43  ;;  %580 = vmatpush1.msra.mxu1 %v525_v44  ;;  %v342_v3 = vld [vmem:[%s1610_s16] sm:$0xff]  ;;  %v343_v5 = vld [vmem:[%s1610_s16 + $0x8] sm:$0xff]  ;;  %v353_v8 = vld [vmem:[%s1618_s18 + $0x18] sm:$0xff] }
  0x92   : > { %424 = vmatprep.subr.mxu0 %v367_v45  ;;  %581 = vmatprep.subr.mxu1 %v524_v46  ;;  %v345_v9 = vld [vmem:[%s1610_s16 + $0x18] sm:$0xff]  ;;  %v354_v10 = vld [vmem:[%s1618_s18 + $0x20] sm:$0xff]  ;;  %v355_v12 = vld [vmem:[%s1618_s18 + $0x28] sm:$0xff] }
  0x93   : > { %425 = vmatpush1.msra.mxu0 %v366_v47  ;;  %582 = vmatpush1.msra.mxu1 %v523_v48  ;;  %v346_v11 = vld [vmem:[%s1610_s16 + $0x20] sm:$0xff]  ;;  %v347_v13 = vld [vmem:[%s1610_s16 + $0x28] sm:$0xff]  ;;  %v356_v14 = vld [vmem:[%s1618_s18 + $0x30] sm:$0xff] }
  0x94   : > { %426 = vmatprep.subr.mxu0 %v365_v49  ;;  %583 = vmatprep.subr.mxu1 %v522_v50  ;;  %v348_v15 = vld [vmem:[%s1610_s16 + $0x30] sm:$0xff]  ;;  %v357_v16 = vld [vmem:[%s1618_s18 + $0x38] sm:$0xff]  ;;  %v1670_v21 = vld [vmem:[%s1890_s5] sm:$0x3] }
  0x95   : > { %427 = vmatpush1.msra.mxu0 %v364_v51  ;;  %584 = vmatpush1.msra.mxu1 %v521_v52  ;;  %v349_v17 = vld [vmem:[%s1610_s16 + $0x38] sm:$0xff]  ;;  %v1675_v22 = vld [vmem:[%s1889_s4] sm:$0x3]  ;;  %s1307_s16 = scalar_lea.vmem %s1306_s15, 2048 }
  0x96   : > { %428 = vmatprep.subr.mxu0 %v363_v53  ;;  %585 = vmatprep.subr.mxu1 %v520_v54  ;;  %v1681_v23 = vrot.slane %v1675_v22, %v394_v20  ;;  %p1309_p1 = scmp.lt.s32.totalorder %s1307_s16, %s1301_s13 }
  0x97   : > { %429 = vmatpush1.msra.mxu0 %v362_v55  ;;  %586 = vmatpush1.msra.mxu1 %v519_v56 }
  0x98   : > { %430 = vmatprep.subr.mxu0 %v361_v57  ;;  %587 = vmatprep.subr.mxu1 %v518_v58  ;;  %p1310_p4 = por %p1309_p1, %p1308_p5 }
  0x99   : > { %431 = vmatpush1.msra.mxu0 %v360_v59  ;;  %588 = vmatpush1.msra.mxu1 %v517_v60 }
  0x9a   : > { %432 = vmatprep.subr.mxu0 %v359_v61  ;;  %589 = vmatprep.subr.mxu1 %v516_v62  ;;  %p1311_p3 = pnand %p1310_p4, %p1304_p13 }
  0x9b   : > { %433 = vmatpush1.msra.mxu0 %v358_v63  ;;  %590 = vmatpush1.msra.mxu1 %v515_v1 }
  0x9c   : > { %467 = vmatmul.mubr.f32.vlgmr.msra.gmra.mxu0 %v350_v2  ;;  %624 = vmatmul.mubr.f32.vlgmr.msra.gmra.mxu1 %v342_v3 }
  0x9d   : > { %472 = vmatprep.mubr.f32.mxu0 %v1387_v0  ;;  %629 = vmatprep.mubr.f32.mxu1 %v1387_v0 }
  0xa0   : > { %473 = vmatmul.mubr.f32.gmra.mxu0 %v351_v4  ;;  %630 = vmatmul.mubr.f32.gmra.mxu1 %v343_v5 }
  0xa1   : > { %478 = vmatprep.mubr.f32.mxu0 %v1387_v0  ;;  %635 = vmatprep.mubr.f32.mxu1 %v1387_v0 }
  0xa4   : > { %479 = vmatmul.mubr.f32.gmra.mxu0 %v352_v6  ;;  %636 = vmatmul.mubr.f32.gmra.mxu1 %v344_v7 }
  0xa5   : > { %484 = vmatprep.mubr.f32.mxu0 %v1387_v0  ;;  %641 = vmatprep.mubr.f32.mxu1 %v1387_v0 }
  0xa8   : > { %485 = vmatmul.mubr.f32.gmra.mxu0 %v353_v8  ;;  %642 = vmatmul.mubr.f32.gmra.mxu1 %v345_v9 }
  0xa9   : > { %490 = vmatprep.mubr.f32.mxu0 %v1387_v0  ;;  %647 = vmatprep.mubr.f32.mxu1 %v1387_v0 }
  0xac   : > { %491 = vmatmul.mubr.f32.gmra.mxu0 %v354_v10  ;;  %648 = vmatmul.mubr.f32.gmra.mxu1 %v346_v11 }
  0xad   : > { %496 = vmatprep.mubr.f32.mxu0 %v1387_v0  ;;  %653 = vmatprep.mubr.f32.mxu1 %v1387_v0 }
  0xb0   : > { %497 = vmatmul.mubr.f32.gmra.mxu0 %v355_v12  ;;  %654 = vmatmul.mubr.f32.gmra.mxu1 %v347_v13 }
  0xb1   : > { %502 = vmatprep.mubr.f32.mxu0 %v1387_v0  ;;  %659 = vmatprep.mubr.f32.mxu1 %v1387_v0 }
  0xb4   : > { %503 = vmatmul.mubr.f32.gmra.mxu0 %v356_v14  ;;  %660 = vmatmul.mubr.f32.gmra.mxu1 %v348_v15 }
  0xb5   : > { %508 = vmatprep.mubr.f32.mxu0 %v1387_v0  ;;  %665 = vmatprep.mubr.f32.mxu1 %v1387_v0  ;;  %v1678_v0 = vrot.slane %v1670_v21, %v394_v20 }
  0xb8   : > { %509 = vmatmul.mubr.f32.gmra.mxu0 %v357_v16  ;;  %666 = vmatmul.mubr.f32.gmra.mxu1 %v349_v17 }
 0x15c   : > { %v468_v24 = vpop.f32.mrf.mxu0  ;;  %v625_v25 = vpop.f32.mrf.mxu1 }
 0x15d   : > { %v469_v26 = vadd.f32 %v468_v24, %v1678_v0  ;;  %v626_v27 = vadd.f32 %v625_v25, %v1681_v23 }
 0x15e   : > { %v1685_v28 = vpop.f32.mrf.mxu0  ;;  %v1687_v29 = vpop.f32.mrf.mxu1 }
 0x15f   : > { %v672_v30 = vsub.f32 0.0, %v469_v26  ;;  %v736_v31 = vsub.f32 0.0, %v626_v27 }
 0x160   : > { %v474_v32 = vpop.f32.mrf.mxu0  ;;  %v631_v33 = vpop.f32.mrf.mxu1 }
 0x161   : > { %v680_v34 = vmul.f32 1.442695, %v672_v30  ;;  %v744_v35 = vmul.f32 1.442695, %v736_v31  ;;  %v475_v36 = vadd.f32 %v474_v32, %v1678_v0  ;;  %v632_v37 = vadd.f32 %v631_v33, %v1681_v23 }
 0x162   : > { %v1691_v38 = vpop.f32.mrf.mxu0  ;;  %v1693_v39 = vpop.f32.mrf.mxu1 }
 0x163   : > { %1113 = vpow2.f32 %v680_v34  ;;  %v673_v40 = vsub.f32 0.0, %v475_v36  ;;  %v737_v41 = vsub.f32 0.0, %v632_v37 }
 0x164   : > { %1115 = vpow2.f32 %v744_v35  ;;  %v480_v42 = vpop.f32.mrf.mxu0  ;;  %v637_v43 = vpop.f32.mrf.mxu1 }
 0x165   : > { %v682_v44 = vmul.f32 1.442695, %v673_v40  ;;  %v746_v45 = vmul.f32 1.442695, %v737_v41  ;;  %v481_v46 = vadd.f32 %v480_v42, %v1678_v0  ;;  %v638_v47 = vadd.f32 %v637_v43, %v1681_v23 }
 0x166   : > { %v1697_v48 = vpop.f32.mrf.mxu0  ;;  %v1699_v49 = vpop.f32.mrf.mxu1 }
 0x167   : > { %1117 = vpow2.f32 %v682_v44  ;;  %v674_v50 = vsub.f32 0.0, %v481_v46  ;;  %v738_v51 = vsub.f32 0.0, %v638_v47 }
 0x168   : > { %1119 = vpow2.f32 %v746_v45  ;;  %v486_v52 = vpop.f32.mrf.mxu0  ;;  %v643_v53 = vpop.f32.mrf.mxu1 }
 0x169   : > { %v684_v54 = vmul.f32 1.442695, %v674_v50  ;;  %v748_v55 = vmul.f32 1.442695, %v738_v51  ;;  %v487_v56 = vadd.f32 %v486_v52, %v1678_v0  ;;  %v644_v57 = vadd.f32 %v643_v53, %v1681_v23 }
 0x16a   : > { %v1703_v58 = vpop.f32.mrf.mxu0  ;;  %v1705_v59 = vpop.f32.mrf.mxu1 }
 0x16b   : > { %1121 = vpow2.f32 %v684_v54  ;;  %v675_v60 = vsub.f32 0.0, %v487_v56  ;;  %v739_v61 = vsub.f32 0.0, %v644_v57 }
 0x16c   : > { %1123 = vpow2.f32 %v748_v55  ;;  %v492_v62 = vpop.f32.mrf.mxu0  ;;  %v649_v63 = vpop.f32.mrf.mxu1 }
 0x16d   : > { %v686_v1 = vmul.f32 1.442695, %v675_v60  ;;  %v750_v2 = vmul.f32 1.442695, %v739_v61  ;;  %v493_v3 = vadd.f32 %v492_v62, %v1678_v0  ;;  %v650_v4 = vadd.f32 %v649_v63, %v1681_v23 }
 0x16e   : > { %v1709_v5 = vpop.f32.mrf.mxu0  ;;  %v1711_v6 = vpop.f32.mrf.mxu1 }
 0x16f   : > { %1125 = vpow2.f32 %v686_v1  ;;  %v676_v7 = vsub.f32 0.0, %v493_v3  ;;  %v740_v8 = vsub.f32 0.0, %v650_v4 }
 0x170   : > { %v1114_v9 = vpop.eup %1113  ;;  %1127 = vpow2.f32 %v750_v2  ;;  %v498_v10 = vpop.f32.mrf.mxu0 }
 0x171   : > { %v655_v11 = vpop.f32.mrf.mxu1  ;;  %v1116_v12 = vpop.eup %1115  ;;  %v696_v13 = vadd.f32 1.0, %v1114_v9  ;;  %v688_v14 = vmul.f32 1.442695, %v676_v7  ;;  %v499_v15 = vadd.f32 %v498_v10, %v1678_v0  ;;  %v752_v17 = vmul.f32 1.442695, %v740_v8 }
 0x172   : > { %v760_v16 = vadd.f32 1.0, %v1116_v12  ;;  %v656_v18 = vadd.f32 %v655_v11, %v1681_v23  ;;  %v1715_v20 = vpop.f32.mrf.mxu0 }
 0x173   : > { %v1717_v24 = vpop.f32.mrf.mxu1  ;;  %1129 = vrcp.f32 %v696_v13  ;;  %v677_v25 = vsub.f32 0.0, %v499_v15 }
 0x174   : > { %v1118_v26 = vpop.eup %1117  ;;  %1131 = vrcp.f32 %v760_v16  ;;  %v741_v27 = vsub.f32 0.0, %v656_v18  ;;  %v504_v30 = vpop.f32.mrf.mxu0 }
 0x175   : > { %v661_v31 = vpop.f32.mrf.mxu1  ;;  %v1120_v32 = vpop.eup %1119  ;;  %v697_v33 = vadd.f32 1.0, %v1118_v26  ;;  %1133 = vpow2.f32 %v688_v14  ;;  %v690_v34 = vmul.f32 1.442695, %v677_v25  ;;  %v505_v35 = vadd.f32 %v504_v30, %v1678_v0 }
 0x176   : > { %v761_v36 = vadd.f32 1.0, %v1120_v32  ;;  %1135 = vpow2.f32 %v752_v17  ;;  %v754_v37 = vmul.f32 1.442695, %v741_v27  ;;  %v662_v40 = vadd.f32 %v661_v31, %v1681_v23  ;;  %v1721_v41 = vpop.f32.mrf.mxu0 }
 0x177   : > { %v1723_v42 = vpop.f32.mrf.mxu1  ;;  %1137 = vrcp.f32 %v697_v33  ;;  %v678_v43 = vsub.f32 0.0, %v505_v35 }
 0x178   : > { %v1122_v44 = vpop.eup %1121  ;;  %1139 = vrcp.f32 %v761_v36  ;;  %v742_v45 = vsub.f32 0.0, %v662_v40  ;;  %v510_v46 = vpop.f32.mrf.mxu0 }
 0x179   : > { %v667_v47 = vpop.f32.mrf.mxu1  ;;  %v1124_v50 = vpop.eup %1123  ;;  %v698_v51 = vadd.f32 1.0, %v1122_v44  ;;  %1141 = vpow2.f32 %v690_v34  ;;  %v692_v52 = vmul.f32 1.442695, %v678_v43  ;;  %v511_v53 = vadd.f32 %v510_v46, %v1678_v0 }
 0x17a   : > { %v762_v54 = vadd.f32 1.0, %v1124_v50  ;;  %1143 = vpow2.f32 %v754_v37  ;;  %v756_v55 = vmul.f32 1.442695, %v742_v45  ;;  %v668_v56 = vadd.f32 %v667_v47, %v1681_v23 }
 0x17b   : > { %1145 = vrcp.f32 %v698_v51  ;;  %v679_v57 = vsub.f32 0.0, %v511_v53 }
 0x17c   : > { %v1126_v60 = vpop.eup %1125  ;;  %1147 = vrcp.f32 %v762_v54  ;;  %v743_v61 = vsub.f32 0.0, %v668_v56 }
 0x17d   : > { %v1128_v62 = vpop.eup %1127  ;;  %v699_v63 = vadd.f32 1.0, %v1126_v60  ;;  %1149 = vpow2.f32 %v692_v52  ;;  %v694_v1 = vmul.f32 1.442695, %v679_v57 }
 0x17e   : > { %v763_v2 = vadd.f32 1.0, %v1128_v62  ;;  %1151 = vpow2.f32 %v756_v55  ;;  %v758_v3 = vmul.f32 1.442695, %v743_v61 }
 0x17f   : > { %1153 = vrcp.f32 %v699_v63 }
 0x180   : > { %v1130_v4 = vpop.eup %1129  ;;  %1155 = vrcp.f32 %v763_v2 }
 0x181   : > { %v1132_v0 = vpop.eup %1131  ;;  %v712_v7 = vmul.f32 %v1130_v4, %v696_v13  ;;  %1157 = vpow2.f32 %v694_v1 }
 0x182   : > { %v1134_v8 = vpop.eup %1133  ;;  %v776_v23 = vmul.f32 %v1132_v0, %v760_v16  ;;  %1159 = vpow2.f32 %v758_v3 }
 0x183   : > { %v1136_v9 = vpop.eup %1135  ;;  %v720_v10 = vsub.f32 2.0, %v712_v7  ;;  %v700_v11 = vadd.f32 1.0, %v1134_v8 }
 0x184   : > { %v1138_v12 = vpop.eup %1137  ;;  %v784_v14 = vsub.f32 2.0, %v776_v23  ;;  %v764_v15 = vadd.f32 1.0, %v1136_v9 }
 0x185   : > { %v1140_v17 = vpop.eup %1139  ;;  %v728_v18 = vmul.f32 %v1130_v4, %v720_v10  ;;  %v713_v25 = vmul.f32 %v1138_v12, %v697_v33  ;;  %1161 = vrcp.f32 %v700_v11 }
 0x186   : > { %v1142_v26 = vpop.eup %1141  ;;  %v792_v27 = vmul.f32 %v1132_v0, %v784_v14  ;;  %v777_v30 = vmul.f32 %v1140_v17, %v761_v36  ;;  %1163 = vrcp.f32 %v764_v15  ;;  %v398_v36 = vsub.s32 1, %v1664_v19 }
 0x187   : > { %v1144_v31 = vpop.eup %1143  ;;  %v721_v13 = vsub.f32 2.0, %v713_v25  ;;  %v701_v32 = vadd.f32 1.0, %v1142_v26 }
 0x188   : > { %v1146_v34 = vpop.eup %1145  ;;  %v824_v16 = vadd.f32 %v792_v27, %v728_v18  ;;  %v785_v35 = vsub.f32 2.0, %v777_v30  ;;  %v765_v37 = vadd.f32 1.0, %v1144_v31  ;;  %v1741_v3 = vrot.slane %v1670_v21, %v398_v36 }
 0x189   : > { %v1148_v40 = vpop.eup %1147  ;;  %v1727_v43 = vmul.f32 %v1138_v12, %v721_v13  ;;  %v714_v44 = vmul.f32 %v1146_v34, %v698_v51  ;;  %1165 = vrcp.f32 %v701_v32  ;;  %v1747_v7 = vrot.slane %v1675_v22, %v398_v36 }
 0x18a   : > { %v1150_v45 = vpop.eup %1149  ;;  %1167 = vrcp.f32 %v824_v16  ;;  %v1729_v33 = vmul.f32 %v1140_v17, %v785_v35  ;;  %v778_v46 = vmul.f32 %v1148_v40, %v762_v54  ;;  %v471_v22 = vadd.f32 %v1685_v28, %v1741_v3 }
 0x18b   : > { %v1152_v47 = vpop.eup %1151  ;;  %v722_v50 = vsub.f32 2.0, %v714_v44  ;;  %1169 = vrcp.f32 %v765_v37  ;;  %v702_v52 = vadd.f32 1.0, %v1150_v45  ;;  %v628_v14 = vadd.f32 %v1687_v29, %v1747_v7 }
 0x18c   : > { %v1154_v53 = vpop.eup %1153  ;;  %v825_v55 = vadd.f32 %v1729_v33, %v1727_v43  ;;  %v786_v56 = vsub.f32 2.0, %v778_v46  ;;  %v1734_v57 = vadd.f32 1.0, %v1152_v47  ;;  %v800_v31 = vmul.f32 %v728_v18, %v471_v22 }
 0x18d   : > { %v1156_v51 = vpop.eup %1155  ;;  %v1736_v60 = vmul.f32 %v1146_v34, %v722_v50  ;;  %v715_v61 = vmul.f32 %v1154_v53, %v699_v63  ;;  %1171 = vrcp.f32 %v702_v52  ;;  %v808_v13 = vmul.f32 %v792_v27, %v628_v14 }
 0x18e   : > { %v1158_v62 = vpop.eup %1157  ;;  %1173 = vrcp.f32 %v825_v55  ;;  %v1738_v54 = vmul.f32 %v1148_v40, %v786_v56  ;;  %v779_v19 = vmul.f32 %v1156_v51, %v763_v2  ;;  %v477_v29 = vadd.f32 %v1691_v38, %v1741_v3 }
 0x18f   : > { %v1160_v1 = vpop.eup %1159  ;;  %v723_v4 = vsub.f32 2.0, %v715_v61  ;;  %1175 = vrcp.f32 %v1734_v57  ;;  %v1744_v0 = vadd.f32 1.0, %v1158_v62  ;;  %v816_v47 = vadd.f32 %v808_v13, %v800_v31 }
 0x190   : > { %v1751_v63 = vadd.f32 %v1738_v54, %v1736_v60  ;;  %v787_v8 = vsub.f32 2.0, %v779_v19  ;;  %v1753_v23 = vadd.f32 1.0, %v1160_v1  ;;  %v483_v50 = vadd.f32 %v1697_v48, %v1741_v3 }
 0x191   : > { %v1755_v2 = vmul.f32 %v1154_v53, %v723_v4  ;;  %1177 = vrcp.f32 %v1744_v0  ;;  %v801_v53 = vmul.f32 %v1727_v43, %v477_v29  ;;  %v640_v48 = vadd.f32 %v1699_v49, %v1747_v7 }
 0x192   : > { %v1162_v21 = vpop.eup %1161  ;;  %1179 = vrcp.f32 %v1751_v63  ;;  %v1759_v9 = vmul.f32 %v1156_v51, %v787_v8 }
 0x193   : > { %v1164_v10 = vpop.eup %1163  ;;  %v716_v12 = vmul.f32 %v1162_v21, %v700_v11  ;;  %1181 = vrcp.f32 %v1753_v23 }
 0x194   : > { %v1768_v17 = vadd.f32 %v1759_v9, %v1755_v2  ;;  %v780_v25 = vmul.f32 %v1164_v10, %v764_v15  ;;  %v634_v15 = vadd.f32 %v1693_v39, %v1747_v7 }
 0x195   : > { %v724_v26 = vsub.f32 2.0, %v716_v12  ;;  %v810_v12 = vmul.f32 %v1738_v54, %v640_v48  ;;  %v646_v54 = vadd.f32 %v1705_v59, %v1747_v7 }
 0x196   : > { %v1166_v30 = vpop.eup %1165  ;;  %1183 = vrcp.f32 %v1768_v17  ;;  %v788_v11 = vsub.f32 2.0, %v780_v25 }
 0x197   : > { %v1168_v34 = vpop.eup %1167  ;;  %v1771_v35 = vmul.f32 %v1162_v21, %v724_v26  ;;  %v717_v40 = vmul.f32 %v1166_v30, %v701_v32 }
 0x198   : > { %v1170_v28 = vpop.eup %1169  ;;  %v840_v44 = vmul.f32 %v1168_v34, %v824_v16  ;;  %v1773_v45 = vmul.f32 %v1164_v10, %v788_v11 }
 0x199   : > { %v725_v46 = vsub.f32 2.0, %v717_v40  ;;  %v781_v18 = vmul.f32 %v1170_v28, %v765_v37  ;;  %v809_v37 = vmul.f32 %v1729_v33, %v634_v15 }
 0x19a   : > { %v1172_v27 = vpop.eup %1171  ;;  %v848_v36 = vsub.f32 2.0, %v840_v44  ;;  %v1783_v32 = vadd.f32 %v1773_v45, %v1771_v35 }
 0x19b   : > { %v1174_v16 = vpop.eup %1173  ;;  %v1786_v56 = vmul.f32 %v1166_v30, %v725_v46  ;;  %v789_v38 = vsub.f32 2.0, %v781_v18  ;;  %v718_v51 = vmul.f32 %v1172_v27, %v702_v52  ;;  %v802_v52 = vmul.f32 %v1736_v60, %v483_v50 }
 0x19c   : > { %v1176_v39 = vpop.eup %1175  ;;  %v856_v61 = vmul.f32 %v1168_v34, %v848_v36  ;;  %v841_v62 = vmul.f32 %v1174_v16, %v825_v55  ;;  %1185 = vrcp.f32 %v1783_v32  ;;  %v817_v49 = vadd.f32 %v809_v37, %v801_v53 }
 0x19d   : > { %v797_v19 = vmul.f32 %v1170_v28, %v789_v38  ;;  %v726_v1 = vsub.f32 2.0, %v718_v51  ;;  %v782_v4 = vmul.f32 %v1176_v39, %v1734_v57  ;;  %v489_v60 = vadd.f32 %v1703_v58, %v1741_v3 }
 0x19e   : > { %v1178_v43 = vpop.eup %1177  ;;  %v864_v8 = vmul.f32 %v856_v61, %v816_v47  ;;  %v849_v21 = vsub.f32 2.0, %v841_v62  ;;  %v818_v28 = vadd.f32 %v810_v12, %v802_v52 }
 0x19f   : > { %v1180_v10 = vpop.eup %1179  ;;  %v829_v33 = vadd.f32 %v797_v19, %v1786_v56  ;;  %v734_v55 = vmul.f32 %v1172_v27, %v726_v1  ;;  %v790_v22 = vsub.f32 2.0, %v782_v4  ;;  %v719_v26 = vmul.f32 %v1178_v43, %v1744_v0 }
 0x1a0   : > { %v1182_v14 = vpop.eup %1181  ;;  %872 = vst [vmem:[%s1797_s17] sm:$0xff] %v864_v8  ;;  %v857_v25 = vmul.f32 %v1174_v16, %v849_v21  ;;  %v842_v57 = vmul.f32 %v1180_v10, %v1751_v63  ;;  %v803_v63 = vmul.f32 %v1755_v2, %v489_v60  ;;  %v811_v0 = vmul.f32 %v1759_v9, %v646_v54 }
 0x1a1   : > { %1187 = vrcp.f32 %v829_v33  ;;  %v798_v30 = vmul.f32 %v1176_v39, %v790_v22  ;;  %v727_v11 = vsub.f32 2.0, %v719_v26  ;;  %v783_v34 = vmul.f32 %v1182_v14, %v1753_v23 }
 0x1a2   : > { %v865_v31 = vmul.f32 %v857_v25, %v817_v49  ;;  %v850_v13 = vsub.f32 2.0, %v842_v57  ;;  %v495_v23 = vadd.f32 %v1709_v5, %v1741_v3  ;;  %v819_v47 = vadd.f32 %v811_v0, %v803_v63 }
 0x1a3   : > { %v1184_v40 = vpop.eup %1183  ;;  %v830_v44 = vadd.f32 %v798_v30, %v734_v55  ;;  %v735_v59 = vmul.f32 %v1178_v43, %v727_v11  ;;  %v791_v15 = vsub.f32 2.0, %v783_v34  ;;  %v652_v9 = vadd.f32 %v1711_v6, %v1747_v7 }
 0x1a4   : > { %873 = vst [vmem:[%s1797_s17 + $0x8] sm:$0xff] %v865_v31  ;;  %v858_v58 = vmul.f32 %v1180_v10, %v850_v13  ;;  %v843_v29 = vmul.f32 %v1184_v40, %v1768_v17  ;;  %v804_v17 = vmul.f32 %v1771_v35, %v495_v23  ;;  %v501_v5 = vadd.f32 %v1715_v20, %v1741_v3 }
 0x1a5   : > { %1189 = vrcp.f32 %v830_v44  ;;  %v799_v27 = vmul.f32 %v1182_v14, %v791_v15  ;;  %v812_v53 = vmul.f32 %v1773_v45, %v652_v9  ;;  %v658_v39 = vadd.f32 %v1717_v24, %v1747_v7 }
 0x1a6   : > { %v866_v46 = vmul.f32 %v858_v58, %v818_v28  ;;  %v851_v18 = vsub.f32 2.0, %v843_v29  ;;  %v805_v35 = vmul.f32 %v1786_v56, %v501_v5  ;;  %v664_v4 = vadd.f32 %v1723_v42, %v1747_v7  ;;  %v512_v56 = vpop.f32.mrf.mxu0 }
 0x1a7   : > { %v831_v36 = vadd.f32 %v799_v27, %v735_v59  ;;  %v820_v61 = vadd.f32 %v812_v53, %v804_v17  ;;  %v813_v62 = vmul.f32 %v797_v19, %v658_v39  ;;  %v669_v19 = vpop.f32.mrf.mxu1 }
 0x1a8   : > { %874 = vst [vmem:[%s1797_s17 + $0x10] sm:$0xff] %v866_v46  ;;  %v859_v2 = vmul.f32 %v1184_v40, %v851_v18  ;;  %v814_v21 = vmul.f32 %v798_v30, %v664_v4 }
 0x1a9   : > { %v1186_v50 = vpop.eup %1185  ;;  %1191 = vrcp.f32 %v831_v36  ;;  %v821_v43 = vadd.f32 %v813_v62, %v805_v35 }
 0x1aa   : > { %v867_v16 = vmul.f32 %v859_v2, %v819_v47  ;;  %v844_v38 = vmul.f32 %v1186_v50, %v1783_v32  ;;  %v507_v32 = vadd.f32 %v1721_v41, %v1741_v3  ;;  %v513_v41 = vadd.f32 %v512_v56, %v1741_v3 }
 0x1ac   : > { %875 = vst [vmem:[%s1797_s17 + $0x18] sm:$0xff] %v867_v16  ;;  %v852_v51 = vsub.f32 2.0, %v844_v38  ;;  %v806_v8 = vmul.f32 %v734_v55, %v507_v32  ;;  %v807_v55 = vmul.f32 %v735_v59, %v513_v41 }
 0x1ae   : > { %v1188_v6 = vpop.eup %1187  ;;  %v860_v37 = vmul.f32 %v1186_v50, %v852_v51  ;;  %v822_v42 = vadd.f32 %v814_v21, %v806_v8 }
 0x1af   : > { %v845_v48 = vmul.f32 %v1188_v6, %v829_v33  ;;  %v670_v33 = vadd.f32 %v669_v19, %v1747_v7 }
 0x1b0   : > { %v868_v45 = vmul.f32 %v860_v37, %v820_v61 }
 0x1b1   : > { %v853_v1 = vsub.f32 2.0, %v845_v48  ;;  %v815_v49 = vmul.f32 %v799_v27, %v670_v33 }
 0x1b2   : > { %v1190_v20 = vpop.eup %1189  ;;  %876 = vst [vmem:[%s1797_s17 + $0x20] sm:$0xff] %v868_v45 }
 0x1b3   : > { %v861_v24 = vmul.f32 %v1188_v6, %v853_v1  ;;  %v846_v52 = vmul.f32 %v1190_v20, %v830_v44  ;;  %v823_v60 = vadd.f32 %v815_v49, %v807_v55 }
 0x1b5   : > { %v869_v10 = vmul.f32 %v861_v24, %v821_v43  ;;  %v854_v12 = vsub.f32 2.0, %v846_v52 }
 0x1b6   : > { %v1192_v22 = vpop.eup %1191 }
 0x1b7   : > { %877 = vst [vmem:[%s1797_s17 + $0x28] sm:$0xff] %v869_v10  ;;  %v862_v14 = vmul.f32 %v1190_v20, %v854_v12  ;;  %v847_v25 = vmul.f32 %v1192_v22, %v831_v36 }
 0x1b9   : > { %v870_v57 = vmul.f32 %v862_v14, %v822_v42  ;;  %v855_v26 = vsub.f32 2.0, %v847_v25 }
 0x1bb   : > { %878 = vst [vmem:[%s1797_s17 + $0x30] sm:$0xff] %v870_v57  ;;  %v863_v54 = vmul.f32 %v1192_v22, %v855_v26 }
 0x1bd   : > { %v871_v3 = vmul.f32 %v863_v54, %v823_v60 }
 0x1bf   : > { %879 = vst [vmem:[%s1797_s17 + $0x38] sm:$0xff] %v871_v3 }
 0x1c0   : > { %1314 = shalt.err (!%p1311_p3)
}
 0x1c1   : > { %s1315_s2 = scalar_lea.hbm %s1839_s14, 1024  ;;  %s1319_s27 = scalar_lea.hbm %s1891_s6, 2048 }
 0x1c2   : > { %p1316_p2 = scmp.ne.s32.totalorder %s1839_s14, %s1315_s2  ;;  %p1320_p11 = scmp.lt.s32.totalorder %s1839_s14, %s1891_s6 }
 0x1c3   : > { %p1321_p10 = scmp.lt.s32.totalorder %s1319_s27, %s1315_s2 }
 0x1c4   : > { %p1317_p0 = pnand %p1316_p2, %p1915_p7 }
 0x1c5   : > { %p1322_p6 = por %p1321_p10, %p1320_p11 }
 0x1c6   : > { %p1318_p8 = pneg %p1317_p0 }
 0x1c8   : > { %p1323_p12 = pnand %p1322_p6, %p1318_p8 }
 0x1ca   : > { %1326 = shalt.err (!%p1323_p12)
}
 0x1cb   : > { %s1389_s26 = smov 128   ;;  %s1390_s17 = smov 8  }
 0x1cc   : > { %1046 = dma.vmem_to_hbm [thread:$0]  (%p1915_p7), %s1841_s10, 1024, %s1839_s14, %s881_s20, %s1389_s26, %s1389_s26, %s1390_s17  }
 0x1cd PF: > { %s909_s12 = sand.u32 1, %s1365_s21   ;;  %p1916_p9 = scmp.ne.s32.totalorder %s1900_s28, 0 }
 0x1ce   : > { %p1917_p13 = scmp.ge.s32.totalorder %s1377_s24, 2  ;;  %s910_s0 = scalar_lea.sflag [#allocation4], %s909_s12 }
 0x1d0   : > { %p1063_p5 = pnand %p1917_p13, %p1916_p9 }
 0x1d2   : > { %p1064_p1 = pneg %p1063_p5 }
 0x1d4   : > { %1360 = dma.done.wait (%p1064_p1), %s910_s0, 1024  }
 0x1d5   : > { %1362 = vsyncadd (%p1064_p1), %s910_s0, 4294966272  ;;  %p23_p4 = scmp.ge.s32.totalorder %s1498_s19, 4   ;;  %s1918_s21 = smov %s1369_s22 }
 0x1d6   : > { %s1919_s22 = smov %s1373_s23  ;;  %s1920_s23 = smov %s1514_s7 }
 0x1d7   : > { %s1921_s24 = smov %s1498_s19  ;;  %25 = sbr.rel (!%p23_p4) target bundleno = 12 (0xc), region = 110 }
 0x1dc   :  { %915 = vsyncpa [#allocation3], 1 }
 0x1dd   :  { %917 = vsyncpa [#allocation3 + $0x1], 1 }
 0x1de   :  { %918 = vsyncpa [#allocation6], 1 }
 0x1df   :  { %920 = vsyncpa [#allocation6 + $0x1], 1 }
 0x1e0   :  { %921 = vsyncpa [#allocation9], 1 }
 0x1e1   :  { %922 = vsyncpa [#allocation4], 1 }
 0x1e2   :  { %924 = vsyncpa [#allocation4 + $0x1], 1 }

</bundles_post_ra>
